<compile_context>
chip_gen: v7x
topology: tpu7x:2x2x1
jax: 0.10.0
libtpu: 0.0.40
codegen_flags: <defaults>
</compile_context>

<pallas_src>
import functools

import jax
import jax.numpy as jnp
from jax.experimental import pallas as pl
from jax.experimental.pallas import tpu as pltpu


# ---------------------------------------------------------------------------
# Kernel
# ---------------------------------------------------------------------------
def _self_output_kernel(x_ref, r_ref, wT_ref, b_ref, g_ref, beta_ref, o_ref,
                        *, eps):
    # x_ref, r_ref : (TM, D) native-dtype row tiles (dense input, residual)
    # wT_ref       : (D, D)  pre-transposed dense weight (in_dim, out_dim)
    # b_ref, g_ref, beta_ref : (1, D) float32 (bias, LN gamma, LN beta)
    # o_ref        : (TM, D)

    # Dense projection on the MXU (native dtype in, f32 accumulate), bias and
    # residual fused into the same expression (one live (TM, D) f32 tile).
    # Dropout(hidden_dropout_prob) is eval-mode identity.
    h = (jnp.dot(x_ref[...], wT_ref[...], preferred_element_type=jnp.float32)
         + b_ref[...]
         + r_ref[...].astype(jnp.float32))

    # LayerNorm over the hidden dimension, f32 statistics.
    mean = jnp.mean(h, axis=-1, keepdims=True)
    h = h - mean
    var = jnp.mean(h * h, axis=-1, keepdims=True)
    inv = jax.lax.rsqrt(var + eps)              # EUP rsqrt (its own VLIW slot)

    # Single lane-dense (TM, D) store.
    o_ref[...] = (h * (inv * g_ref[...]) + beta_ref[...]).astype(o_ref.dtype)


# ---------------------------------------------------------------------------
# Tiling / VMEM budgeting helpers
# ---------------------------------------------------------------------------
def _round_up(x, m):
    return ((x + m - 1) // m) * m


def _vmem_budget_bytes():
    """Generation-aware VMEM budget (v5e/v6e: 128 MiB/TC, v7x: 64 MiB/TC)."""
    cap = None
    try:
        cap = int(pltpu.get_tpu_info().vmem_capacity_bytes)
    except Exception:
        cap = None
    if not cap or cap <= 0:
        cap = 64 * 1024 * 1024          # conservative: v7x per-TensorCore VMEM
    # Leave headroom for compiler-internal scratch; never ask for more than
    # 96 MiB even on 128 MiB parts.
    return min((cap * 3) // 4, 96 * 1024 * 1024)


def _pick_row_tile(M, D, act_bytes, w_bytes, budget_bytes):
    """Largest row tile whose pipelined VMEM footprint fits the budget."""
    usable = int(budget_bytes * 0.85)
    # Keep >= 2 grid steps when M allows it (both v7x TensorCores get work).
    cap = max(8, _round_up((M + 1) // 2, 8))
    for tm in (2048, 1024, 512, 256, 128, 64, 32, 16, 8):
        tm_eff = min(tm, cap)
        est = (3 * 2 * tm_eff * D * act_bytes   # x, r, out tiles, double-buffered
               + 2 * D * D * w_bytes            # (D, D) weight block allocation
               + 2 * tm_eff * D * 4             # live f32 epilogue temporaries
               + 8 * D * 4)                     # bias / gamma / beta rows
        if est <= usable:
            return tm_eff
    return 8


# ---------------------------------------------------------------------------
# Wrapper
# ---------------------------------------------------------------------------
def prepare_bert_self_output_params(params, compute_dtype=None):
    """One-time parameter prep: transpose torch (out,in) weight, lift vectors to f32."""
    D = params["w"].shape[0]
    wT = jnp.asarray(params["w"]).T             # (in, out), materialized once
    if compute_dtype is not None:
        wT = wT.astype(compute_dtype)
    return {
        "wT": wT,
        "b": jnp.asarray(params["b"], jnp.float32).reshape(1, D),
        "gamma": jnp.asarray(params["gamma"], jnp.float32).reshape(1, D),
        "beta": jnp.asarray(params["beta"], jnp.float32).reshape(1, D),
    }


def bert_self_output(hidden_states, input_tensor, prepared, *, eps=1e-12,
                     compute_dtype=None):
    """hidden_states, input_tensor: (B, S, D). prepared: prepare_bert_self_output_params(...)."""
    B, S, D = hidden_states.shape
    M = B * S

    x2d = hidden_states.reshape(M, D)
    r2d = input_tensor.reshape(M, D)
    if compute_dtype is not None:
        x2d = x2d.astype(compute_dtype)
        r2d = r2d.astype(compute_dtype)
    wT = prepared["wT"]

    budget = _vmem_budget_bytes()
    TM = _pick_row_tile(M, D,
                        jnp.dtype(x2d.dtype).itemsize,
                        jnp.dtype(wT.dtype).itemsize,
                        budget)
    grid_m = pl.cdiv(M, TM)
    M_total = grid_m * TM

    # Pad the ragged row tail with zeros (per-row LayerNorm -> padded rows are
    # independent; they are sliced off below).
    if M_total != M:
        pad = M_total - M
        x2d = jnp.pad(x2d, ((0, pad), (0, 0)))
        r2d = jnp.pad(r2d, ((0, pad), (0, 0)))

    kernel = functools.partial(_self_output_kernel, eps=eps)

    row_spec = pl.BlockSpec((TM, D), lambda i: (i, 0))
    const2d = pl.BlockSpec((D, D), lambda i: (0, 0))   # DMA'd once (constant index)
    const1d = pl.BlockSpec((1, D), lambda i: (0, 0))

    out2d = pl.pallas_call(
        kernel,
        out_shape=jax.ShapeDtypeStruct((M_total, D), hidden_states.dtype),
        grid_spec=pltpu.PrefetchScalarGridSpec(
            num_scalar_prefetch=0,
            grid=(grid_m,),
            in_specs=[
                row_spec,    # hidden_states rows
                row_spec,    # residual rows
                const2d,     # dense weight^T
                const1d,     # dense bias
                const1d,     # LN gamma
                const1d,     # LN beta
            ],
            out_specs=row_spec,
        ),
        compiler_params=pltpu.CompilerParams(
            dimension_semantics=("parallel",),
            vmem_limit_bytes=budget,
        ),
    )(x2d, r2d, wT, prepared["b"], prepared["gamma"], prepared["beta"])

    return out2d[:M].reshape(B, S, D)


# ---------------------------------------------------------------------------
# Reference + self-test
# ---------------------------------------------------------------------------
def _reference(hidden_states, input_tensor, params, *, eps=1e-12):
    y = hidden_states @ params["w"].T + params["b"]
    h = y + input_tensor
    mean = h.mean(axis=-1, keepdims=True)
    var = ((h - mean) ** 2).mean(axis=-1, keepdims=True)
    return (h - mean) / jnp.sqrt(var + eps) * params["gamma"] + params["beta"]


if __name__ == "__main__":
    eps = 1e-12
    key = jax.random.PRNGKey(0)
    keys = jax.random.split(key, 6)

    # Small, module-consistent config: batch=2, seq=8, hidden=32.
    B, S, D = 2, 8, 32
    std = 0.02
    params = {
        "w": std * jax.random.normal(keys[0], (D, D), jnp.float32),
        "b": std * jax.random.normal(keys[1], (D,), jnp.float32),
        "gamma": 1.0 + 0.1 * jax.random.normal(keys[2], (D,), jnp.float32),
        "beta": 0.1 * jax.random.normal(keys[3], (D,), jnp.float32),
    }
    hidden_states = jax.random.normal(keys[4], (B, S, D), jnp.float32)
    input_tensor = jax.random.normal(keys[5], (B, S, D), jnp.float32)

    # f32 path (native dtype straight to the MXU, f32 accumulation).
    prepared = prepare_bert_self_output_params(params)
    out = bert_self_output(hidden_states, input_tensor, prepared, eps=eps)
    out = jax.block_until_ready(out)
    ref = _reference(hidden_states, input_tensor, params, eps=eps)
    assert out.shape == (B, S, D)
    assert jnp.allclose(out, ref, atol=2e-5, rtol=2e-5)

    # Ragged row count + bf16 MXU path (exercises cdiv grid + padding and the
    # wrapper-side bf16 cast; looser tolerance for bf16 inputs).
    B2, S2 = 1, 5
    hs2 = jax.random.normal(jax.random.PRNGKey(1), (B2, S2, D), jnp.float32)
    in2 = jax.random.normal(jax.random.PRNGKey(2), (B2, S2, D), jnp.float32)
    prepared_bf16 = prepare_bert_self_output_params(params,
                                                    compute_dtype=jnp.bfloat16)
    out2 = bert_self_output(hs2, in2, prepared_bf16, eps=eps,
                            compute_dtype=jnp.bfloat16)
    out2 = jax.block_until_ready(out2)
    ref2 = _reference(hs2, in2, params, eps=eps)
    assert out2.shape == (B2, S2, D)
    assert jnp.allclose(out2, ref2, atol=6e-2, rtol=6e-2)

    print("KERNEL_OK")
</pallas_src>

<mosaic_0001>
module attributes {stable_mosaic.version = 11 : i64} {
  func.func @_self_output_kernel(%arg0: i32, %arg1: memref<8x32xf32, #tpu.memory_space<vmem>>, %arg2: memref<8x32xf32, #tpu.memory_space<vmem>>, %arg3: memref<32x32xf32, #tpu.memory_space<vmem>>, %arg4: memref<1x32xf32, #tpu.memory_space<vmem>>, %arg5: memref<1x32xf32, #tpu.memory_space<vmem>>, %arg6: memref<1x32xf32, #tpu.memory_space<vmem>>, %arg7: memref<8x32xf32, #tpu.memory_space<vmem>>) attributes {dimension_semantics = [#tpu.dimension_semantics<parallel>], iteration_bounds = array<i64: 2>, scalar_prefetch = 0 : i64, scratch_operands = 0 : i64, tpu.core_type = #tpu.core_type<tc>, window_params = [{transform_indices = @transform_0, window_bounds = array<i64: 8, 32>}, {transform_indices = @transform_1, window_bounds = array<i64: 8, 32>}, {pipeline_mode = #tpu.pipeline_mode<synchronous>, transform_indices = @transform_2, window_bounds = array<i64: 32, 32>}, {pipeline_mode = #tpu.pipeline_mode<synchronous>, transform_indices = @transform_3, window_bounds = array<i64: 1, 32>}, {pipeline_mode = #tpu.pipeline_mode<synchronous>, transform_indices = @transform_4, window_bounds = array<i64: 1, 32>}, {pipeline_mode = #tpu.pipeline_mode<synchronous>, transform_indices = @transform_5, window_bounds = array<i64: 1, 32>}, {transform_indices = @transform_6, window_bounds = array<i64: 8, 32>}]} {
    %c0 = arith.constant 0 : index
    %c0_0 = arith.constant 0 : index
    %0 = vector.load %arg1[%c0, %c0_0] : memref<8x32xf32, #tpu.memory_space<vmem>>, vector<8x32xf32>
    %c0_1 = arith.constant 0 : index
    %c0_2 = arith.constant 0 : index
    %1 = vector.load %arg3[%c0_1, %c0_2] : memref<32x32xf32, #tpu.memory_space<vmem>>, vector<32x32xf32>
    %cst = arith.constant dense<0.000000e+00> : vector<8x32xf32>
    %2 = tpu.matmul %0, %1, %cst {dimension_numbers = #tpu.dot_dimension_numbers<[1], [0], [0], [1], [0, 0, 1, 1], [], []>} : vector<8x32xf32>, vector<32x32xf32>, vector<8x32xf32> -> vector<8x32xf32>
    %c0_3 = arith.constant 0 : index
    %c0_4 = arith.constant 0 : index
    %3 = vector.load %arg4[%c0_3, %c0_4] : memref<1x32xf32, #tpu.memory_space<vmem>>, vector<1x32xf32>
    %4 = vector.broadcast %3 : vector<1x32xf32> to vector<8x32xf32>
    %5 = arith.addf %2, %4 : vector<8x32xf32>
    %c0_5 = arith.constant 0 : index
    %c0_6 = arith.constant 0 : index
    %6 = vector.load %arg2[%c0_5, %c0_6] : memref<8x32xf32, #tpu.memory_space<vmem>>, vector<8x32xf32>
    %7 = arith.addf %5, %6 : vector<8x32xf32>
    %cst_7 = arith.constant dense<0.000000e+00> : vector<8xf32>
    %8 = vector.multi_reduction <add>, %7, %cst_7 [1] : vector<8x32xf32> to vector<8xf32>
    %9 = vector.shape_cast %8 : vector<8xf32> to vector<8x1xf32>
    %cst_8 = arith.constant 3.200000e+01 : f32
    %10 = vector.broadcast %cst_8 : f32 to vector<8x1xf32>
    %11 = arith.divf %9, %10 : vector<8x1xf32>
    %12 = vector.broadcast %11 : vector<8x1xf32> to vector<8x32xf32>
    %13 = arith.subf %7, %12 : vector<8x32xf32>
    %14 = arith.mulf %13, %13 : vector<8x32xf32>
    %cst_9 = arith.constant dense<0.000000e+00> : vector<8xf32>
    %15 = vector.multi_reduction <add>, %14, %cst_9 [1] : vector<8x32xf32> to vector<8xf32>
    %16 = vector.shape_cast %15 : vector<8xf32> to vector<8x1xf32>
    %cst_10 = arith.constant 3.200000e+01 : f32
    %17 = vector.broadcast %cst_10 : f32 to vector<8x1xf32>
    %18 = arith.divf %16, %17 : vector<8x1xf32>
    %cst_11 = arith.constant 9.99999996E-13 : f32
    %19 = vector.broadcast %cst_11 : f32 to vector<8x1xf32>
    %20 = arith.addf %18, %19 : vector<8x1xf32>
    %21 = math.rsqrt %20 : vector<8x1xf32>
    %c0_12 = arith.constant 0 : index
    %c0_13 = arith.constant 0 : index
    %22 = vector.load %arg5[%c0_12, %c0_13] : memref<1x32xf32, #tpu.memory_space<vmem>>, vector<1x32xf32>
    %23 = vector.broadcast %21 : vector<8x1xf32> to vector<8x32xf32>
    %24 = vector.broadcast %22 : vector<1x32xf32> to vector<8x32xf32>
    %25 = arith.mulf %23, %24 : vector<8x32xf32>
    %26 = arith.mulf %13, %25 : vector<8x32xf32>
    %c0_14 = arith.constant 0 : index
    %c0_15 = arith.constant 0 : index
    %27 = vector.load %arg6[%c0_14, %c0_15] : memref<1x32xf32, #tpu.memory_space<vmem>>, vector<1x32xf32>
    %28 = vector.broadcast %27 : vector<1x32xf32> to vector<8x32xf32>
    %29 = arith.addf %26, %28 : vector<8x32xf32>
    %c0_16 = arith.constant 0 : index
    %c0_17 = arith.constant 0 : index
    %30 = vector.load %arg7[%c0_16, %c0_17] : memref<8x32xf32, #tpu.memory_space<vmem>>, vector<8x32xf32>
    tpu.vector_store %arg7[%c0_16, %c0_17], %29 {strides = array<i32>} : memref<8x32xf32, #tpu.memory_space<vmem>>, vector<8x32xf32>,
    return
  }
  func.func @transform_0(%arg0: i32) -> (i32, i32) {
    %c0_i32 = arith.constant 0 : i32
    %c0_i32_0 = arith.constant 0 : i32
    return %arg0, %c0_i32 : i32, i32
  }
  func.func @transform_1(%arg0: i32) -> (i32, i32) {
    %c0_i32 = arith.constant 0 : i32
    %c0_i32_0 = arith.constant 0 : i32
    return %arg0, %c0_i32 : i32, i32
  }
  func.func @transform_2(%arg0: i32) -> (i32, i32) {
    %c0_i32 = arith.constant 0 : i32
    %c0_i32_0 = arith.constant 0 : i32
    %c0_i32_1 = arith.constant 0 : i32
    return %c0_i32, %c0_i32_0 : i32, i32
  }
  func.func @transform_3(%arg0: i32) -> (i32, i32) {
    %c0_i32 = arith.constant 0 : i32
    %c0_i32_0 = arith.constant 0 : i32
    %c0_i32_1 = arith.constant 0 : i32
    return %c0_i32, %c0_i32_0 : i32, i32
  }
  func.func @transform_4(%arg0: i32) -> (i32, i32) {
    %c0_i32 = arith.constant 0 : i32
    %c0_i32_0 = arith.constant 0 : i32
    %c0_i32_1 = arith.constant 0 : i32
    return %c0_i32, %c0_i32_0 : i32, i32
  }
  func.func @transform_5(%arg0: i32) -> (i32, i32) {
    %c0_i32 = arith.constant 0 : i32
    %c0_i32_0 = arith.constant 0 : i32
    %c0_i32_1 = arith.constant 0 : i32
    return %c0_i32, %c0_i32_0 : i32, i32
  }
  func.func @transform_6(%arg0: i32) -> (i32, i32) {
    %c0_i32 = arith.constant 0 : i32
    %c0_i32_0 = arith.constant 0 : i32
    return %arg0, %c0_i32 : i32, i32
  }
}

</mosaic_0001>

<bundles_post_ra>
// kernel: tpu_custom_call.1
= control target key start
LH: loop header
LB: loop body
LE: loop exit
PB: predicated region body
PF: predicated region fallthrough
CT: control target
= control target key end

     0   :  { %s1121_s0 = inlined_call_operand.hbm [shape: f32[16,32], index: 0, kind: input, shape index: {}]   ;;  %s1122_s1 = inlined_call_operand.hbm [shape: f32[16,32], index: 1, kind: input, shape index: {}]   ;;  %s1123_s2 = inlined_call_operand.hbm [shape: f32[32,32], index: 2, kind: input, shape index: {}]   ;;  %s1124_s3 = inlined_call_operand.vmem [shape: f32[1,32], index: 3, kind: input, shape index: {}]   ;;  %s1125_s4 = inlined_call_operand.vmem [shape: f32[1,32], index: 4, kind: input, shape index: {}]   ;;  %s1126_s5 = inlined_call_operand.vmem [shape: f32[1,32], index: 5, kind: input, shape index: {}]   ;;  %s1127_s6 = inlined_call_operand.hbm [shape: f32[16,32], index: 6, kind: output, shape index: {}]  }
   0x1   :  { %1133 = sst [smem:[#allocation15_spill]] %s1123_s2 }
   0x2   :  { %11 = vsyncpa [#allocation3], 0 }
   0x3   :  { %13 = vsyncpa [#allocation3 + $0x1], 0 }
   0x4   :  { %14 = vsyncpa [#allocation6], 0 }
   0x5   :  { %16 = vsyncpa [#allocation6 + $0x1], 0 }
   0x6   :  { %17 = vsyncpa [#allocation4], 0 }
   0x7   :  { %19 = vsyncpa [#allocation4 + $0x1], 0  ;;  %s873_s21 = smov 0   ;;  %s875_s22 = smov 0  }
   0x8   :  { %s877_s23 = smov 0   ;;  %s879_s24 = smov 0  }
   0x9 LB: > { %1134 = sst [smem:[#allocation13_spill]] %s823_s23  ;;  %s894_s25 = sadd.s32 4294967295, %s827_s24   ;;  %s827_s24 = sphi %s879_s24, %s1156_s24   ;;  %s823_s23 = sphi %s877_s23, %s1155_s23   ;;  %s819_s22 = sphi %s875_s22, %s1154_s22   ;;  %s815_s21 = sphi %s873_s21, %s1153_s21  }
   0xa   : > { %s553_s26 = sadd.s32 4294967294, %s827_s24   ;;  %p45_p0 = scmp.ne.s32.totalorder %s819_s22, %s815_s21 }
   0xb   : > { %p1128_p1 = scmp.eq.s32.totalorder %s894_s25, 0  ;;  %p185_p3 = scmp.eq.s32.totalorder %s553_s26, 1 }
   0xc   : > { %p554_p5 = scmp.ge.s32.totalorder %s827_s24, 1  ;;  %p192_p7 = scmp.lt.s32.totalorder %s827_s24, 3 }
   0xd   : > { %p903_p4 = por %p1128_p1, %p45_p0  ;;  %p908_p6 = por %p185_p3, %p45_p0 }
   0xe   : > { %p913_p8 = pnand %p554_p5, %p192_p7  ;;  %s829_s30 = smov [#allocation7]  }
   0xf   : > { %s1135_s27 = scalar_select %p903_p4, 1, 0 }
  0x10   : > { %s1136_s28 = scalar_select %p908_p6, 1, 0 }
  0x11   : > { %s1137_s29 = scalar_select %p913_p8, 1, 0 }
  0x12   : > { %s204_s7 = sshll.u32 %s829_s30, 4  ;;  %p606_p9 = pneg %p913_p8  ;;  %s917_s7 = int_to_ptr.vmem [resolvable:$true] %s204_s7 }
  0x13   : > { %s929_s9 = sadd.s32 1, %s827_s24   ;;  %s32_s10 = sadd.s32 1, %s823_s23 }
  0x14   : > { %p924_p11 = pnand %p606_p9, %p1128_p1  ;;  %s29_s11 = ssub.s32 %s827_s24, %s929_s9 }
  0x15   : > { %s1139_s2 = sld [smem:[#allocation15_spill]] }
  0x16   : > { %p667_p13 = pneg %p924_p11 }
  0x1b   : > { %s665_s14 = scalar_lea.hbm %s1139_s2, 512 }
  0x1c   : > { %p666_p12 = scmp.ne.s32.totalorder %s1139_s2, %s665_s14  ;;  %p672_p5 = scmp.lt.u32.totalorder %s665_s14, %s1139_s2 }
  0x1e   : > { %p668_p0 = pnand %p667_p13, %p666_p12 }
  0x20   : > { %p669_p3 = pneg %p668_p0 }
  0x22   : > { %p674_p7 = pnand %p672_p5, %p669_p3 }
  0x24   : > { %677 = shalt.err (!%p674_p7)
}
  0x25   : > { %s678_s19 = scalar_lea.vmem %s917_s7, 512  ;;  %p686_p2 = scmp.lt.s32.totalorder %s917_s7, %s917_s7 }
  0x26   : > { %p679_p9 = scmp.ne.s32.totalorder %s917_s7, %s678_s19  ;;  %p687_p6 = scmp.lt.s32.totalorder %s678_s19, %s678_s19 }
  0x28   : > { %p681_p10 = pnand %p679_p9, %p667_p13  ;;  %p688_p4 = por %p687_p6, %p686_p2 }
  0x2a   : > { %p682_p1 = pneg %p681_p10 }
  0x2c   : > { %p689_p8 = pnand %p688_p4, %p682_p1 }
  0x2e   : > { %692 = shalt.err (!%p689_p8)
}
  0x2f   : > { %s830_s20 = smov 128   ;;  %s831_s26 = smov 8  }
  0x30   : > { %609 = dma.hbm_to_vmem [thread:$0]  (!%p924_p11), %s1139_s2, 512, %s917_s7, [#allocation6], %s830_s20, %s830_s20, %s831_s26  }
  0x31   : > { %p30_p2 = scmp.eq.s32.totalorder %s29_s11, 0  ;;  %p39_p1 = scmp.ne.s32.totalorder %s823_s23, %s819_s22 }
  0x32   : > { %p40_p4 = scmp.eq.s32.totalorder %s827_s24, 0  ;;  %p622_p6 = scmp.lt.s32.totalorder %s827_s24, 2 }
  0x33   : > { %s960_s13 = scalar_select %p30_p2, %s823_s23, %s32_s10  }
  0x34   : > { %p41_p8 = por %p40_p4, %p39_p1  ;;  %p1141_p10 = scmp.eq.s32.totalorder %s894_s25, 1 }
  0x35   : > { %1140 = sst [smem:[#allocation14_spill]] %s960_s13  ;;  %s227_s15 = sand.u32 1, %s823_s23  }
  0x36   : > { %p964_p12 = por %p1141_p10, %p39_p1  ;;  %s558_s16 = sshll.u32 %s827_s24, 7 }
  0x37   : > { %s970_s17 = sshll.u32 %s227_s15, 3  ;;  %s975_s7 = scalar_lea.hbm %s1121_s0, %s558_s16 }
  0x38   : > { %s1142_s14 = scalar_select %p964_p12, 1, 0 }
  0x39   : > { %s231_s10 = scalar_lea.vmem [#allocation2], %s970_s17  ;;  %p978_p11 = pnand %p622_p6, %p41_p8 }
  0x3a   : > { %s238_s11 = sshll.u32 %s231_s10, 4  ;;  %s987_s30 = scalar_lea.hbm %s1122_s1, %s558_s16  ;;  %s982_s11 = int_to_ptr.vmem [resolvable:$true] %s238_s11 }
  0x3b   : > { %s228_s12 = scalar_lea.sflag [#allocation3], %s227_s15  ;;  %s693_s8 = scalar_lea.hbm %s975_s7, 128 }
  0x3c   : > { %p694_p13 = scmp.ne.s32.totalorder %s975_s7, %s693_s8  ;;  %p695_p0 = pneg %p978_p11 }
  0x3d   : > { %s698_s2 = scalar_lea.hbm %s1121_s0, 256  ;;  %p699_p7 = scmp.lt.u32.totalorder %s975_s7, %s1121_s0 }
  0x3e   : > { %p696_p3 = pnand %p695_p0, %p694_p13  ;;  %p700_p9 = scmp.lt.u32.totalorder %s698_s2, %s693_s8 }
  0x3f   : > { %p702_p1 = scmp.lt.u32.totalorder %s693_s8, %s975_s7 }
  0x40   : > { %p697_p5 = pneg %p696_p3  ;;  %p701_p2 = por %p700_p9, %p699_p7 }
  0x42   : > { %p703_p4 = por %p702_p1, %p701_p2 }
  0x44   : > { %p704_p6 = pnand %p703_p4, %p697_p5 }
  0x46   : > { %707 = shalt.err (!%p704_p6)
}
  0x47   : > { %s708_s15 = scalar_lea.vmem %s982_s11, 128  ;;  %s832_s16 = smov [#allocation2]  }
  0x48   : > { %p709_p8 = scmp.ne.s32.totalorder %s982_s11, %s708_s15  ;;  %s713_s20 = sshll.u32 %s832_s16, 4  ;;  %s714_s20 = int_to_ptr.vmem [resolvable:$false] %s713_s20 }
  0x49   : > { %s715_s23 = scalar_lea.vmem %s714_s20, 256  ;;  %p716_p3 = scmp.lt.s32.totalorder %s982_s11, %s714_s20 }
  0x4a   : > { %p711_p10 = pnand %p709_p8, %p695_p0  ;;  %p717_p7 = scmp.lt.s32.totalorder %s715_s23, %s708_s15 }
  0x4c   : > { %p712_p13 = pneg %p711_p10  ;;  %p718_p9 = por %p717_p7, %p716_p3 }
  0x4e   : > { %p719_p2 = pnand %p718_p9, %p712_p13 }
  0x50   : > { %722 = shalt.err (!%p719_p2)
}
  0x51   : > { %613 = dma.hbm_to_vmem [thread:$0]  (!%p978_p11), %s975_s7, 128, %s982_s11, %s228_s12  }
  0x52   : > { %s245_s2 = sand.u32 1, %s827_s24   ;;  %s249_s13 = scalar_lea.vmem [#allocation5], %s970_s17 }
  0x53   : > { %s256_s26 = sshll.u32 %s249_s13, 4  ;;  %s246_s8 = scalar_lea.sflag [#allocation6], %s245_s2  ;;  %s257_s26 = int_to_ptr.vmem [resolvable:$true] %s256_s26 }
  0x54   : > { %s723_s18 = scalar_lea.hbm %s987_s30, 128  ;;  %s728_s16 = scalar_lea.hbm %s1122_s1, 256 }
  0x55   : > { %p724_p5 = scmp.ne.s32.totalorder %s987_s30, %s723_s18  ;;  %p729_p6 = scmp.lt.u32.totalorder %s987_s30, %s1122_s1 }
  0x56   : > { %p730_p8 = scmp.lt.u32.totalorder %s728_s16, %s723_s18  ;;  %p732_p13 = scmp.lt.u32.totalorder %s723_s18, %s987_s30 }
  0x57   : > { %p726_p1 = pnand %p724_p5, %p695_p0 }
  0x58   : > { %p731_p10 = por %p730_p8, %p729_p6 }
  0x59   : > { %p727_p4 = pneg %p726_p1 }
  0x5a   : > { %p733_p3 = por %p732_p13, %p731_p10 }
  0x5c   : > { %p734_p7 = pnand %p733_p3, %p727_p4 }
  0x5e   : > { %737 = shalt.err (!%p734_p7)
}
  0x5f   : > { %s738_s17 = scalar_lea.vmem %s257_s26, 128  ;;  %s833_s7 = smov [#allocation5]  }
  0x60   : > { %p739_p9 = scmp.ne.s32.totalorder %s257_s26, %s738_s17  ;;  %s743_s11 = sshll.u32 %s833_s7, 4  ;;  %s744_s11 = int_to_ptr.vmem [resolvable:$false] %s743_s11 }
  0x61   : > { %s745_s12 = scalar_lea.vmem %s744_s11, 256  ;;  %p746_p1 = scmp.lt.s32.totalorder %s257_s26, %s744_s11 }
  0x62   : > { %p741_p2 = pnand %p739_p9, %p695_p0  ;;  %p747_p12 = scmp.lt.s32.totalorder %s745_s12, %s738_s17 }
  0x64   : > { %p742_p5 = pneg %p741_p2  ;;  %p748_p6 = por %p747_p12, %p746_p1 }
  0x66   : > { %p749_p8 = pnand %p748_p6, %p742_p5 }
  0x68   : > { %752 = shalt.err (!%p749_p8)
}
  0x69   : > { %616 = dma.hbm_to_vmem [thread:$0]  (!%p978_p11), %s987_s30, 128, %s257_s26, %s246_s8  }
  0x6a   : > { %p1144_p4 = scmp.ne.s32.totalorder %s1137_s29, 0 }
  0x6b   : > { %s1038_s2 = sand.u32 (!%p1144_p4), 1, %s819_s22   ;;  %p1145_p12 = scmp.ne.s32.totalorder (!%p1144_p4), %s1135_s27, 0 }
  0x6c   : > { %265 = sbr.rel (%p1144_p4) target bundleno = 675 (0x2a3), region = 44  ;;  %s1041_s13 = sshll.u32 (!%p1144_p4), %s1038_s2, 3 }
  0x6d   : > { %s268_s18 = scalar_lea.sflag (!%p1144_p4), [#allocation3], %s1038_s2  ;;  %s271_s10 = scalar_lea.vmem (!%p1144_p4), [#allocation2], %s1041_s13 }
  0x73   : > { %798 = dma.done.wait (%p1145_p12), %s268_s18, 128  }
  0x74   : > { %800 = vsyncadd (%p1145_p12), %s268_s18, 4294967168  ;;  %s276_s29 = sand.u32 1, %s894_s25   ;;  %s280_s30 = scalar_lea.vmem [#allocation5], %s1041_s13 }
  0x75   : > { %s277_s19 = scalar_lea.sflag [#allocation6], %s276_s29 }
  0x76   : > { %802 = dma.done.wait (%p1145_p12), %s277_s19, 128  }
  0x77   : > { %804 = vsyncadd (%p1145_p12), %s277_s19, 4294967168  ;;  %p1146_p11 = scmp.eq.s32.totalorder %s894_s25, 0 }
  0x79   : > { %806 = dma.done.wait (%p1146_p11), [#allocation6], 512   ;;  %p1147_p0 = pmov %p1146_p11 }
  0x7a   : > { %v834_v0 = vmov 0.0|0.0   ;;  %vm835_vm0 = vmmov 0   ;;  %v836_v1 = vmov 0.0   ;;  %v319_v2 = vld [vmem:[#allocation7] sm:$0xff]  ;;  %v320_v3 = vld [vmem:[#allocation7 + $0x8] sm:$0xff]  ;;  %v321_v4 = vld [vmem:[#allocation7 + $0x10] sm:$0xff] }
  0x7b   : > { %808 = vsyncadd (%p1147_p0), [#allocation6], 4294966784  ;;  %590 = vmatprep.subr.bf16.mxu0 %v834_v0  ;;  %587 = vmatprep.mubr.msk.f32.mxu0 %vm835_vm0, %v836_v1  ;;  %v591_v5 = vpack.c.bf16 %v320_v3, %v319_v2  ;;  %v322_v6 = vld [vmem:[#allocation7 + $0x18] sm:$0xff]  ;;  %v318_v8 = vld [vmem:[%s271_s10] sm:$0xff]  ;;  %vm330_vm1 = vcmask 261120   ;;  %s571_s23 = sshll.u32 %s894_s25, 7 }
  0x7c   : > { %v594_v7 = vpack.c.bf16 %v322_v6, %v321_v4  ;;  %v566_v9 = vld [vmem:[%s1124_s3] ss:$0 sm:$0xff]  ;;  %v404_v11 = vld [vmem:[%s280_s30] sm:$0xff]  ;;  %s317_s17 = scalar_lea.vmem [#allocation8], %s1041_s13  ;;  %s1076_s18 = scalar_lea.hbm %s1127_s6, %s571_s23 }
  0x7d   : > { %592 = vmatpush3.bf16.msra.mxu0 %v591_v5  ;;  %v568_v24 = vld [vmem:[%s1125_s4] ss:$0 sm:$0xff]  ;;  %s451_s7 = sshll.u32 %s317_s17, 4  ;;  %s438_s10 = scalar_lea.sflag [#allocation4], %s1038_s2  ;;  %s1078_s7 = int_to_ptr.vmem [resolvable:$true] %s451_s7 }
  0x7e   : > { %593 = vmatprep.subr.bf16.mxu0 %v834_v0  ;;  %v569_v27 = vld [vmem:[%s1126_s5] ss:$0 sm:$0xff]  ;;  %s753_s29 = scalar_lea.vmem %s1078_s7, 128  ;;  %p1148_p13 = scmp.ne.s32.totalorder %s1142_s14, 0 }
  0x7f   : > { %p754_p10 = scmp.ne.s32.totalorder %s1078_s7, %s753_s29  ;;  %s837_s25 = smov [#allocation8]  }
  0x80   : > { %s757_s13 = sshll.u32 %s837_s25, 4  ;;  %s758_s13 = int_to_ptr.vmem [resolvable:$false] %s757_s13 }
  0x81   : > { %595 = vmatpush3.bf16.msra.mxu0 %v594_v7  ;;  %p755_p3 = pnand %p754_p10, %p1148_p13  ;;  %s759_s19 = scalar_lea.vmem %s758_s13, 256 }
  0x82   : > { %p760_p9 = scmp.lt.s32.totalorder %s1078_s7, %s758_s13  ;;  %p761_p2 = scmp.lt.s32.totalorder %s759_s19, %s753_s29 }
  0x83   : > { %p756_p7 = pneg %p755_p3 }
  0x84   : > { %588 = vmatmul.mubr.msk.f32.vlgmr.msra.gmra.mrb[0].mxu0 %vm330_vm1, %v318_v8  ;;  %p762_p5 = por %p761_p2, %p760_p9 }
  0x86   : > { %p763_p1 = pnand %p762_p5, %p756_p7 }
 0x157   : > { %v400_v10 = vpop.f32.mrb[0].mxu0 }
 0x158   : > { %v401_v12 = vadd.f32 %v566_v9, %v400_v10  ;;  %v589_v13 = vpop.f32.mrb[1].mxu0 }
 0x15a   : > { %v405_v14 = vadd.f32 %v404_v11, %v401_v12 }
 0x15c   : > { %v406_v15 = vsel %vm330_vm1, %v405_v14, 0.0 }
 0x15d   : > { %407 = vadd.xlane.f32.xlu0 %v406_v15 }
 0x1ea   : > { %v408_v16 = vpop.xlane.xlu0 %407 }
 0x1eb   : > { %v410_v17 = vmul.f32 0.03125, %v408_v16 }
 0x1ed   : > { %v411_v18 = vsub.f32 %v405_v14, %v410_v17 }
 0x1ef   : > { %v412_v19 = vmul.f32 %v411_v18, %v411_v18 }
 0x1f1   : > { %v413_v20 = vsel %vm330_vm1, %v412_v19, 0.0 }
 0x1f2   : > { %414 = vadd.xlane.f32.xlu0 %v413_v20 }
 0x27f   : > { %v415_v21 = vpop.xlane.xlu0 %414 }
 0x280   : > { %v416_v22 = vmul.f32 0.03125, %v415_v21 }
 0x282   : > { %v417_v23 = vadd.f32 1e-12, %v416_v22 }
 0x284   : > { %663 = vrsqrt.f32 %v417_v23 }
 0x28e   : > { %v664_v25 = vpop.eup %663 }
 0x28f   : > { %v426_v26 = vmul.f32 %v664_v25, %v568_v24 }
 0x291   : > { %v427_v28 = vmul.f32 %v426_v26, %v411_v18 }
 0x293   : > { %v435_v29 = vadd.f32 %v569_v27, %v427_v28 }
 0x295   : > { %436 = vst.msk [vmem:[%s317_s17] sm:$0xff] %vm330_vm1, %v435_v29 }
 0x296   : > { %766 = shalt.err (!%p763_p1)
}
 0x297   : > { %s767_s2 = scalar_lea.hbm %s1076_s18, 128  ;;  %s771_s26 = scalar_lea.hbm %s1127_s6, 256 }
 0x298   : > { %p768_p6 = scmp.ne.s32.totalorder %s1076_s18, %s767_s2  ;;  %p772_p12 = scmp.lt.u32.totalorder %s1076_s18, %s1127_s6 }
 0x299   : > { %p773_p11 = scmp.lt.u32.totalorder %s771_s26, %s767_s2  ;;  %p775_p10 = scmp.lt.u32.totalorder %s767_s2, %s1076_s18 }
 0x29a   : > { %p769_p8 = pnand %p768_p6, %p1148_p13 }
 0x29b   : > { %p774_p0 = por %p773_p11, %p772_p12 }
 0x29c   : > { %p770_p4 = pneg %p769_p8 }
 0x29d   : > { %p776_p3 = por %p775_p10, %p774_p0 }
 0x29f   : > { %p777_p7 = pnand %p776_p3, %p770_p4 }
 0x2a1   : > { %780 = shalt.err (!%p777_p7)
}
 0x2a2   : > { %604 = dma.vmem_to_hbm [thread:$0]  (%p1148_p13), %s1078_s7, 128, %s1076_s18, %s438_s10  }
 0x2a3 PF: > { %s463_s16 = sand.u32 1, %s815_s21   ;;  %p1149_p9 = scmp.ne.s32.totalorder %s1136_s28, 0 }
 0x2a4   : > { %p1150_p2 = scmp.ge.s32.totalorder %s827_s24, 2  ;;  %s464_s20 = scalar_lea.sflag [#allocation4], %s463_s16 }
 0x2a6   : > { %p618_p5 = pnand %p1150_p2, %p1149_p9 }
 0x2a8   : > { %810 = dma.done.wait (!%p618_p5), %s464_s20, 128  }
 0x2a9   : > { %812 = vsyncadd (!%p618_p5), %s464_s20, 4294967168  ;;  %s1151_s23 = sld [smem:[#allocation13_spill]]  ;;  %s1152_s17 = sld [smem:[#allocation14_spill]] }
 0x2aa   : > { %p22_p1 = scmp.ge.s32.totalorder %s929_s9, 4   ;;  %s1153_s21 = smov %s819_s22 }
 0x2ab   : > { %s1156_s24 = smov %s929_s9 }
 0x2ac   :  { %24 = sbr.rel (!%p22_p1) target bundleno = 9 (0x9), region = 106 }
 0x2af   : > { %s1154_s22 = smov %s1151_s23  ;;  %s1155_s23 = smov %s1152_s17 }
 0x2b3   :  { %469 = vsyncpa [#allocation3], 1 }
 0x2b4   :  { %471 = vsyncpa [#allocation3 + $0x1], 1 }
 0x2b5   :  { %472 = vsyncpa [#allocation6], 1 }
 0x2b6   :  { %474 = vsyncpa [#allocation6 + $0x1], 1 }
 0x2b7   :  { %475 = vsyncpa [#allocation4], 1 }
 0x2b8   :  { %477 = vsyncpa [#allocation4 + $0x1], 1 }

</bundles_post_ra>
